<compile_context>
chip_gen: v5e
topology: v5e:2x2
jax: 0.10.0
libtpu: 0.0.40
codegen_flags: <defaults>
</compile_context>

<pallas_src>
import jax
import jax.numpy as jnp
from jax.experimental import pallas as pl
from jax.experimental.pallas import tpu as pltpu

IN_DIM = 8
HIDDEN = 64
NUM_TASKS = 4


def til_nn_kernel(task_id_ref,                     # scalar-prefetch (SMEM)
                  x_ref,                           # (TB, 8)      compute dtype
                  w1_ref, b1_ref,                  # (64, 8), (64, 1)
                  wh_ref, bh_ref,                  # (3, 64, 64), (3, 64, 1)
                  wc_ref, bc_ref,                  # (64, 1), (1, 1)   task slab
                  o_ref):                          # (1, 1, TB)   float32
    del task_id_ref  # consumed by the classifier BlockSpec index_maps

    # Put the batch on the lane axis: (TB, 8) -> (8, TB).  (XLU transpose; f32.)
    x_t = jnp.transpose(x_ref[...].astype(jnp.float32)).astype(w1_ref.dtype)

    # Layer 1: (64, 8) @ (8, TB) -> (64, TB), f32 accumulation.
    h = jnp.dot(w1_ref[...], x_t, preferred_element_type=jnp.float32)
    h = jnp.maximum(h + b1_ref[...], 0.0)

    # Layers 2-4: (64, 64) @ (64, TB) -> (64, TB).
    for l in range(3):
        h = jnp.dot(wh_ref[l], h.astype(wh_ref.dtype),
                    preferred_element_type=jnp.float32)
        h = jnp.maximum(h + bh_ref[l], 0.0)

    # Dropout(p=0.5): identity in eval/inference mode.

    # Per-task head (64 -> 1): VPU multiply + cross-sublane reduce, lane-dense.
    wc = wc_ref[...].astype(jnp.float32)                         # (64, 1)
    out = jnp.sum(h * wc, axis=0, keepdims=True) + bc_ref[...]   # (1, TB)
    o_ref[...] = out.reshape(o_ref.shape).astype(o_ref.dtype)


def _round_up(n, m):
    return ((n + m - 1) // m) * m


def til_nn_forward(x, params, task_id, *, block_b=1024, compute_dtype=jnp.bfloat16):
    """x: (B, 8) float32; task_id: python int or scalar int; returns (B,) float32."""
    w1, b1, w_hid, b_hid, wc_all, bc_all = params
    if isinstance(task_id, int):
        assert 0 <= task_id < wc_all.shape[0], f"Invalid task_id: {task_id}"
    B = x.shape[0]

    # Batch tile: multiple of 128 so the lane-dense output tile stores unmasked.
    tb = _round_up(min(block_b, _round_up(B, 128)), 128)
    b_pad = _round_up(B, tb)
    if b_pad != B:
        x = jnp.pad(x, ((0, b_pad - B), (0, 0)))
    grid_b = b_pad // tb

    # bf16 operands for the MXU; bias/ReLU/accumulation stay f32 inside the kernel.
    x_c = x.astype(compute_dtype)
    w1_c = w1.astype(compute_dtype)
    w_hid_c = w_hid.astype(compute_dtype)
    task_id_arr = jnp.asarray(task_id, dtype=jnp.int32).reshape(1)

    resident = lambda shape: pl.BlockSpec(shape, lambda i, tid: (0,) * len(shape))

    grid_spec = pltpu.PrefetchScalarGridSpec(
        num_scalar_prefetch=1,
        grid=(grid_b,),
        in_specs=[
            pl.BlockSpec((tb, IN_DIM), lambda i, tid: (i, 0)),        # x (streamed)
            resident((HIDDEN, IN_DIM)), resident((HIDDEN, 1)),        # layer 1
            resident((3, HIDDEN, HIDDEN)), resident((3, HIDDEN, 1)),  # layers 2-4
            # per-task classifier weight/bias: slab picked by prefetched task_id
            pl.BlockSpec((pl.Squeezed(), HIDDEN, 1), lambda i, tid: (tid[0], 0, 0)),
            pl.BlockSpec((pl.Squeezed(), 1, 1), lambda i, tid: (tid[0], 0, 0)),
        ],
        out_specs=pl.BlockSpec((1, 1, tb), lambda i, tid: (i, 0, 0)),
    )

    out = pl.pallas_call(
        til_nn_kernel,
        out_shape=jax.ShapeDtypeStruct((grid_b, 1, tb), jnp.float32),
        grid_spec=grid_spec,
        compiler_params=pltpu.CompilerParams(
            dimension_semantics=("parallel",)),
    )(task_id_arr, x_c, w1_c, b1, w_hid_c, b_hid, wc_all, bc_all)

    # torch.flatten(x, 1).reshape(-1) -> (B,)
    return out.reshape(-1)[:B]


def init_params(key):
    """nn.Linear default init (U(-k, k), k=1/sqrt(fan_in)); PyTorch (out,in) weight layout."""
    ks = jax.random.split(key, 10)

    def linear(kw, kb, fan_in, fan_out):
        bound = float(fan_in) ** -0.5
        w = jax.random.uniform(kw, (fan_out, fan_in), jnp.float32, -bound, bound)
        b = jax.random.uniform(kb, (fan_out, 1), jnp.float32, -bound, bound)
        return w, b

    w1, b1 = linear(ks[0], ks[1], IN_DIM, HIDDEN)
    ws, bs = [], []
    for l in range(3):
        w, b = linear(ks[2 + 2 * l], ks[3 + 2 * l], HIDDEN, HIDDEN)
        ws.append(w)
        bs.append(b)
    w_hid = jnp.stack(ws)                      # (3, 64, 64)
    b_hid = jnp.stack(bs)                      # (3, 64, 1)

    bound = float(HIDDEN) ** -0.5
    wc_all = jax.random.uniform(ks[8], (NUM_TASKS, HIDDEN, 1), jnp.float32, -bound, bound)
    bc_all = jax.random.uniform(ks[9], (NUM_TASKS, 1, 1), jnp.float32, -bound, bound)
    return (w1, b1, w_hid, b_hid, wc_all, bc_all)


def reference_forward(x, params, task_id, compute_dtype=jnp.float32):
    """Pure-JAX reference mirroring the kernel's cast points (f32 accumulation)."""
    w1, b1, w_hid, b_hid, wc_all, bc_all = params
    h = jnp.dot(x.astype(compute_dtype), w1.astype(compute_dtype).T,
                preferred_element_type=jnp.float32)
    h = jnp.maximum(h + b1.reshape(1, -1), 0.0)
    for l in range(3):
        h = jnp.dot(h.astype(compute_dtype), w_hid[l].astype(compute_dtype).T,
                    preferred_element_type=jnp.float32)
        h = jnp.maximum(h + b_hid[l].reshape(1, -1), 0.0)
    out = h @ wc_all[task_id] + bc_all[task_id].reshape(1, 1)
    return out.reshape(-1)


if __name__ == "__main__":
    key = jax.random.PRNGKey(0)
    pkey, xkey = jax.random.split(key)
    params = init_params(pkey)

    B = 512
    x = jax.random.normal(xkey, (B, IN_DIM), dtype=jnp.float32)
    task_id = 2

    # f32 path: tight check against the pure-JAX reference.
    y32 = jax.block_until_ready(
        til_nn_forward(x, params, task_id, block_b=128, compute_dtype=jnp.float32))
    ref32 = reference_forward(x, params, task_id, compute_dtype=jnp.float32)
    assert y32.shape == (B,), y32.shape
    assert jnp.allclose(y32, ref32, atol=1e-4, rtol=1e-4)

    # bf16 operands (the recommended perf configuration), f32 accumulation.
    ybf = jax.block_until_ready(
        til_nn_forward(x, params, task_id, block_b=128, compute_dtype=jnp.bfloat16))
    refbf = reference_forward(x, params, task_id, compute_dtype=jnp.bfloat16)
    assert ybf.shape == (B,), ybf.shape
    assert jnp.allclose(ybf, refbf, atol=5e-3, rtol=5e-3)

    # Non-multiple-of-tile batch exercises the padding path.
    B2 = 200
    x2 = jax.random.normal(jax.random.PRNGKey(1), (B2, IN_DIM), dtype=jnp.float32)
    y2 = jax.block_until_ready(
        til_nn_forward(x2, params, 1, block_b=128, compute_dtype=jnp.float32))
    ref2 = reference_forward(x2, params, 1, compute_dtype=jnp.float32)
    assert y2.shape == (B2,), y2.shape
    assert jnp.allclose(y2, ref2, atol=1e-4, rtol=1e-4)

    print("KERNEL_OK")
</pallas_src>

<mosaic_0001>
module attributes {stable_mosaic.version = 11 : i64} {
  func.func @til_nn_kernel(%arg0: i32, %arg1: memref<1xi32, #tpu.memory_space<smem>>, %arg2: memref<128x8xf32, #tpu.memory_space<vmem>>, %arg3: memref<64x8xf32, #tpu.memory_space<vmem>>, %arg4: memref<64x1xf32, #tpu.memory_space<vmem>>, %arg5: memref<3x64x64xf32, #tpu.memory_space<vmem>>, %arg6: memref<3x64x1xf32, #tpu.memory_space<vmem>>, %arg7: memref<1x64x1xf32, #tpu.memory_space<vmem>>, %arg8: memref<1x1x1xf32, #tpu.memory_space<vmem>>, %arg9: memref<1x1x128xf32, #tpu.memory_space<vmem>>) attributes {dimension_semantics = [#tpu.dimension_semantics<parallel>], iteration_bounds = array<i64: 4>, scalar_prefetch = 1 : i64, scratch_operands = 0 : i64, tpu.core_type = #tpu.core_type<tc>, window_params = [{transform_indices = @transform_0, window_bounds = array<i64: 128, 8>}, {pipeline_mode = #tpu.pipeline_mode<synchronous>, transform_indices = @transform_1, window_bounds = array<i64: 64, 8>}, {pipeline_mode = #tpu.pipeline_mode<synchronous>, transform_indices = @transform_2, window_bounds = array<i64: 64, 1>}, {pipeline_mode = #tpu.pipeline_mode<synchronous>, transform_indices = @transform_3, window_bounds = array<i64: 3, 64, 64>}, {pipeline_mode = #tpu.pipeline_mode<synchronous>, transform_indices = @transform_4, window_bounds = array<i64: 3, 64, 1>}, {transform_indices = @transform_5, window_bounds = array<i64: 1, 64, 1>}, {transform_indices = @transform_6, window_bounds = array<i64: 1, 1, 1>}, {transform_indices = @transform_7, window_bounds = array<i64: 1, 1, 128>}]} {
    %c0 = arith.constant 0 : index
    %c0_0 = arith.constant 0 : index
    %0 = vector.load %arg2[%c0, %c0_0] : memref<128x8xf32, #tpu.memory_space<vmem>>, vector<128x8xf32>
    %1 = tpu.transpose %0, [1, 0] : vector<128x8xf32> -> vector<8x128xf32>
    %c0_1 = arith.constant 0 : index
    %c0_2 = arith.constant 0 : index
    %2 = vector.load %arg3[%c0_1, %c0_2] : memref<64x8xf32, #tpu.memory_space<vmem>>, vector<64x8xf32>
    %cst = arith.constant dense<0.000000e+00> : vector<64x128xf32>
    %3 = tpu.matmul %2, %1, %cst {dimension_numbers = #tpu.dot_dimension_numbers<[1], [0], [0], [1], [0, 0, 1, 1], [], []>} : vector<64x8xf32>, vector<8x128xf32>, vector<64x128xf32> -> vector<64x128xf32>
    %c0_3 = arith.constant 0 : index
    %c0_4 = arith.constant 0 : index
    %4 = vector.load %arg4[%c0_3, %c0_4] : memref<64x1xf32, #tpu.memory_space<vmem>>, vector<64x1xf32>
    %5 = vector.broadcast %4 : vector<64x1xf32> to vector<64x128xf32>
    %6 = arith.addf %3, %5 : vector<64x128xf32>
    %cst_5 = arith.constant 0.000000e+00 : f32
    %7 = vector.broadcast %cst_5 : f32 to vector<64x128xf32>
    %8 = arith.maximumf %6, %7 : vector<64x128xf32>
    %c0_6 = arith.constant 0 : index
    %c0_7 = arith.constant 0 : index
    %c0_8 = arith.constant 0 : index
    %9 = vector.load %arg5[%c0_6, %c0_7, %c0_8] : memref<3x64x64xf32, #tpu.memory_space<vmem>>, vector<1x64x64xf32>
    %10 = vector.shape_cast %9 : vector<1x64x64xf32> to vector<64x64xf32>
    %cst_9 = arith.constant dense<0.000000e+00> : vector<64x128xf32>
    %11 = tpu.matmul %10, %8, %cst_9 {dimension_numbers = #tpu.dot_dimension_numbers<[1], [0], [0], [1], [0, 0, 1, 1], [], []>} : vector<64x64xf32>, vector<64x128xf32>, vector<64x128xf32> -> vector<64x128xf32>
    %c0_10 = arith.constant 0 : index
    %c0_11 = arith.constant 0 : index
    %c0_12 = arith.constant 0 : index
    %12 = vector.load %arg6[%c0_10, %c0_11, %c0_12] : memref<3x64x1xf32, #tpu.memory_space<vmem>>, vector<1x64x1xf32>
    %13 = vector.shape_cast %12 : vector<1x64x1xf32> to vector<64x1xf32>
    %14 = vector.broadcast %13 : vector<64x1xf32> to vector<64x128xf32>
    %15 = arith.addf %11, %14 : vector<64x128xf32>
    %cst_13 = arith.constant 0.000000e+00 : f32
    %16 = vector.broadcast %cst_13 : f32 to vector<64x128xf32>
    %17 = arith.maximumf %15, %16 : vector<64x128xf32>
    %c1 = arith.constant 1 : index
    %c0_14 = arith.constant 0 : index
    %c0_15 = arith.constant 0 : index
    %18 = vector.load %arg5[%c1, %c0_14, %c0_15] : memref<3x64x64xf32, #tpu.memory_space<vmem>>, vector<1x64x64xf32>
    %19 = vector.shape_cast %18 : vector<1x64x64xf32> to vector<64x64xf32>
    %cst_16 = arith.constant dense<0.000000e+00> : vector<64x128xf32>
    %20 = tpu.matmul %19, %17, %cst_16 {dimension_numbers = #tpu.dot_dimension_numbers<[1], [0], [0], [1], [0, 0, 1, 1], [], []>} : vector<64x64xf32>, vector<64x128xf32>, vector<64x128xf32> -> vector<64x128xf32>
    %c1_17 = arith.constant 1 : index
    %c0_18 = arith.constant 0 : index
    %c0_19 = arith.constant 0 : index
    %21 = vector.load %arg6[%c1_17, %c0_18, %c0_19] : memref<3x64x1xf32, #tpu.memory_space<vmem>>, vector<1x64x1xf32>
    %22 = vector.shape_cast %21 : vector<1x64x1xf32> to vector<64x1xf32>
    %23 = vector.broadcast %22 : vector<64x1xf32> to vector<64x128xf32>
    %24 = arith.addf %20, %23 : vector<64x128xf32>
    %cst_20 = arith.constant 0.000000e+00 : f32
    %25 = vector.broadcast %cst_20 : f32 to vector<64x128xf32>
    %26 = arith.maximumf %24, %25 : vector<64x128xf32>
    %c2 = arith.constant 2 : index
    %c0_21 = arith.constant 0 : index
    %c0_22 = arith.constant 0 : index
    %27 = vector.load %arg5[%c2, %c0_21, %c0_22] : memref<3x64x64xf32, #tpu.memory_space<vmem>>, vector<1x64x64xf32>
    %28 = vector.shape_cast %27 : vector<1x64x64xf32> to vector<64x64xf32>
    %cst_23 = arith.constant dense<0.000000e+00> : vector<64x128xf32>
    %29 = tpu.matmul %28, %26, %cst_23 {dimension_numbers = #tpu.dot_dimension_numbers<[1], [0], [0], [1], [0, 0, 1, 1], [], []>} : vector<64x64xf32>, vector<64x128xf32>, vector<64x128xf32> -> vector<64x128xf32>
    %c2_24 = arith.constant 2 : index
    %c0_25 = arith.constant 0 : index
    %c0_26 = arith.constant 0 : index
    %30 = vector.load %arg6[%c2_24, %c0_25, %c0_26] : memref<3x64x1xf32, #tpu.memory_space<vmem>>, vector<1x64x1xf32>
    %31 = vector.shape_cast %30 : vector<1x64x1xf32> to vector<64x1xf32>
    %32 = vector.broadcast %31 : vector<64x1xf32> to vector<64x128xf32>
    %33 = arith.addf %29, %32 : vector<64x128xf32>
    %cst_27 = arith.constant 0.000000e+00 : f32
    %34 = vector.broadcast %cst_27 : f32 to vector<64x128xf32>
    %35 = arith.maximumf %33, %34 : vector<64x128xf32>
    %c0_28 = arith.constant 0 : index
    %c0_29 = arith.constant 0 : index
    %c0_30 = arith.constant 0 : index
    %36 = vector.load %arg7[%c0_28, %c0_29, %c0_30] : memref<1x64x1xf32, #tpu.memory_space<vmem>>, vector<1x64x1xf32>
    %37 = vector.shape_cast %36 : vector<1x64x1xf32> to vector<64x1xf32>
    %38 = vector.broadcast %37 : vector<64x1xf32> to vector<64x128xf32>
    %39 = arith.mulf %35, %38 : vector<64x128xf32>
    %cst_31 = arith.constant dense<0.000000e+00> : vector<128xf32>
    %40 = vector.multi_reduction <add>, %39, %cst_31 [0] : vector<64x128xf32> to vector<128xf32>
    %41 = vector.shape_cast %40 : vector<128xf32> to vector<1x128xf32>
    %c0_32 = arith.constant 0 : index
    %c0_33 = arith.constant 0 : index
    %c0_34 = arith.constant 0 : index
    %42 = vector.load %arg8[%c0_32, %c0_33, %c0_34] : memref<1x1x1xf32, #tpu.memory_space<vmem>>, vector<1x1x1xf32>
    %43 = vector.shape_cast %42 : vector<1x1x1xf32> to vector<1x1xf32>
    %44 = vector.broadcast %43 : vector<1x1xf32> to vector<1x128xf32>
    %45 = arith.addf %41, %44 : vector<1x128xf32>
    %46 = vector.shape_cast %45 : vector<1x128xf32> to vector<1x1x128xf32>
    %c0_35 = arith.constant 0 : index
    %c0_36 = arith.constant 0 : index
    %c0_37 = arith.constant 0 : index
    %47 = vector.load %arg9[%c0_35, %c0_36, %c0_37] : memref<1x1x128xf32, #tpu.memory_space<vmem>>, vector<1x1x128xf32>
    tpu.vector_store %arg9[%c0_35, %c0_36, %c0_37], %46 {strides = array<i32>} : memref<1x1x128xf32, #tpu.memory_space<vmem>>, vector<1x1x128xf32>,
    return
  }
  func.func @transform_0(%arg0: i32, %arg1: memref<1xi32, #tpu.memory_space<smem>>) -> (i32, i32) {
    %c0_i32 = arith.constant 0 : i32
    %c0_i32_0 = arith.constant 0 : i32
    return %arg0, %c0_i32 : i32, i32
  }
  func.func @transform_1(%arg0: i32, %arg1: memref<1xi32, #tpu.memory_space<smem>>) -> (i32, i32) {
    %c0_i32 = arith.constant 0 : i32
    %c0_i32_0 = arith.constant 0 : i32
    %c0_i32_1 = arith.constant 0 : i32
    return %c0_i32, %c0_i32_0 : i32, i32
  }
  func.func @transform_2(%arg0: i32, %arg1: memref<1xi32, #tpu.memory_space<smem>>) -> (i32, i32) {
    %c0_i32 = arith.constant 0 : i32
    %c0_i32_0 = arith.constant 0 : i32
    %c0_i32_1 = arith.constant 0 : i32
    return %c0_i32, %c0_i32_0 : i32, i32
  }
  func.func @transform_3(%arg0: i32, %arg1: memref<1xi32, #tpu.memory_space<smem>>) -> (i32, i32, i32) {
    %c0_i32 = arith.constant 0 : i32
    %c0_i32_0 = arith.constant 0 : i32
    %c0_i32_1 = arith.constant 0 : i32
    %c0_i32_2 = arith.constant 0 : i32
    return %c0_i32, %c0_i32_0, %c0_i32_1 : i32, i32, i32
  }
  func.func @transform_4(%arg0: i32, %arg1: memref<1xi32, #tpu.memory_space<smem>>) -> (i32, i32, i32) {
    %c0_i32 = arith.constant 0 : i32
    %c0_i32_0 = arith.constant 0 : i32
    %c0_i32_1 = arith.constant 0 : i32
    %c0_i32_2 = arith.constant 0 : i32
    return %c0_i32, %c0_i32_0, %c0_i32_1 : i32, i32, i32
  }
  func.func @transform_5(%arg0: i32, %arg1: memref<1xi32, #tpu.memory_space<smem>>) -> (i32, i32, i32) {
    %c0 = arith.constant 0 : index
    %0 = memref.load %arg1[%c0] : memref<1xi32, #tpu.memory_space<smem>>
    %c0_i32 = arith.constant 0 : i32
    %c0_i32_0 = arith.constant 0 : i32
    %c0_i32_1 = arith.constant 0 : i32
    return %0, %c0_i32, %c0_i32_0 : i32, i32, i32
  }
  func.func @transform_6(%arg0: i32, %arg1: memref<1xi32, #tpu.memory_space<smem>>) -> (i32, i32, i32) {
    %c0 = arith.constant 0 : index
    %0 = memref.load %arg1[%c0] : memref<1xi32, #tpu.memory_space<smem>>
    %c0_i32 = arith.constant 0 : i32
    %c0_i32_0 = arith.constant 0 : i32
    %c0_i32_1 = arith.constant 0 : i32
    return %0, %c0_i32, %c0_i32_0 : i32, i32, i32
  }
  func.func @transform_7(%arg0: i32, %arg1: memref<1xi32, #tpu.memory_space<smem>>) -> (i32, i32, i32) {
    %c0_i32 = arith.constant 0 : i32
    %c0_i32_0 = arith.constant 0 : i32
    %c0_i32_1 = arith.constant 0 : i32
    return %arg0, %c0_i32, %c0_i32_0 : i32, i32, i32
  }
}

</mosaic_0001>

<bundles_post_ra>
// kernel: tpu_custom_call.1
= control target key start
LH: loop header
LB: loop body
LE: loop exit
PB: predicated region body
PF: predicated region fallthrough
CT: control target
= control target key end

     0   :  { %s1696_s0 = inlined_call_operand.<no memory space> [shape: s32[1], index: 0, kind: input, shape index: {}]   ;;  %s1697_s1 = inlined_call_operand.vmem [shape: f32[512,8], index: 1, kind: input, shape index: {}]   ;;  %s1698_s2 = inlined_call_operand.vmem [shape: f32[64,8], index: 2, kind: input, shape index: {}]   ;;  %s1699_s3 = inlined_call_operand.vmem [shape: f32[64,1], index: 3, kind: input, shape index: {}]   ;;  %s1700_s4 = inlined_call_operand.vmem [shape: f32[3,64,64], index: 4, kind: input, shape index: {}]   ;;  %s1701_s5 = inlined_call_operand.vmem [shape: f32[3,64,1], index: 5, kind: input, shape index: {}]   ;;  %s1702_s6 = inlined_call_operand.vmem [shape: f32[4,64,1], index: 6, kind: input, shape index: {}]   ;;  %s1703_s7 = inlined_call_operand.vmem [shape: f32[4,1,1], index: 7, kind: input, shape index: {}]   ;;  %s1704_s8 = inlined_call_operand.hbm [shape: f32[4,1,128], index: 8, kind: output, shape index: {}]  }
   0x1   :  { %13 = sst [smem:[#allocation3]] %s1696_s0 }
   0x2   :  { %14 = vsyncpa [#allocation5], 0 }
   0x3   :  { %16 = vsyncpa [#allocation5 + $0x1], 0  ;;  %s1334_s29 = smov 0   ;;  %s1336_s30 = smov 0  }
   0x4   :  { %s1338_s9 = smov 0   ;;  %s1340_s10 = smov 0  }
   0x5 LB: > { %s1355_s0 = sadd.s32 4294967295, %s1283_s10   ;;  %s1087_s11 = sadd.s32 4294967294, %s1283_s10   ;;  %s1283_s10 = sphi %s1340_s10, %s1710_s10   ;;  %s1279_s9 = sphi %s1338_s9, %s1709_s9   ;;  %s1275_s30 = sphi %s1336_s30, %s1708_s30   ;;  %s1271_s29 = sphi %s1334_s29, %s1707_s29  }
   0x6   : > { %s1359_s12 = sadd.s32 1, %s1283_s10   ;;  %s195_s13 = sadd.s32 1, %s1279_s9 }
   0x7   : > { %s192_s14 = ssub.s32 %s1283_s10, %s1359_s12  ;;  %p205_p0 = scmp.ne.s32.totalorder %s1279_s9, %s1275_s30 }
   0x8   : > { %p193_p1 = scmp.eq.s32.totalorder %s192_s14, 0  ;;  %p206_p2 = scmp.eq.s32.totalorder %s1355_s0, 3 }
   0x9   : > { %p211_p3 = scmp.ne.s32.totalorder %s1275_s30, %s1271_s29  ;;  %p212_p4 = scmp.eq.s32.totalorder %s1087_s11, 3 }
   0xa   : > { %s1370_s15 = scalar_select %p193_p1, %s1279_s9, %s195_s13  }
   0xb   : > { %p1372_p5 = por %p206_p2, %p205_p0  ;;  %p1376_p6 = por %p212_p4, %p211_p3 }
   0xc   : > { %p1090_p7 = scmp.ge.s32.totalorder %s1283_s10, 1  ;;  %p269_p8 = scmp.lt.s32.totalorder %s1283_s10, 5 }
   0xe   : > { %p270_p9 = pnand %p1090_p7, %p269_p8 }
   0xf   : > { %s1091_s18 = sshll.u32 (!%p270_p9), %s1355_s0, 4  ;;  %s1001_s11 = scalar_lea.hbm (!%p270_p9), %s1704_s8, %s1355_s0 }
  0x10   : > { %273 = sbr.rel (%p270_p9) target bundleno = 910 (0x38e), region = 48  ;;  %p311_p10 = scmp.lt.s32.totalorder (!%p270_p9), %s1091_s18, 63 }
  0x11   : > { %s1241_s21 = scalar_lea.hbm (!%p270_p9), %s1704_s8, 4 }
  0x15   : > { %v359_v0 = vld [vmem:[%s1699_s3 + $0x38] sm:$0xff]  ;;  %v357_v1 = vld [vmem:[%s1699_s3 + $0x28] sm:$0xff]  ;;  %v1285_v2 = vmov 0   ;;  %s1712_s18 = smov (!%p311_p10, %s1091_s18), 63  ;;  %vm400_vm0 = vcmask 64512   ;;  %v358_v4 = vld [vmem:[%s1699_s3 + $0x30] sm:$0xff] }
  0x16   : > { %1218 = vset.pattern.permute.xlu0 %v1285_v2  ;;  %1219 = vset.pattern.permute.xlu1 %v1285_v2  ;;  %s1092_s23 = sshll.u32 %s1712_s18, 3  ;;  %v356_v5 = vld [vmem:[%s1699_s3 + $0x20] sm:$0xff]  ;;  %v353_v8 = vld [vmem:[%s1699_s3 + $0x8] sm:$0xff]  ;;  %v536_v12 = vld [vmem:[%s1701_s5 + $0x30] sm:$0xff]  ;;  %vm578_vm1 = vcmask 523264   ;;  %s1005_s18 = sshll.u32 %s1001_s11, 4  ;;  %s1006_s18 = int_to_ptr.hbm [resolvable:$true] %s1005_s18 }
  0x17   : > { %397 = vperm.xlu0 %1218, %v359_v0   ;;  %387 = vperm.xlu1 %1219, %v357_v1   ;;  %s1392_s26 = scalar_lea.vmem %s1697_s1, %s1092_s23  ;;  %v352_v9 = vld [vmem:[%s1699_s3] sm:$0xff]  ;;  %v535_v13 = vld [vmem:[%s1701_s5 + $0x28] sm:$0xff]  ;;  %v533_v16 = vld [vmem:[%s1701_s5 + $0x18] sm:$0xff]  ;;  %s316_s23 = sld [smem:[#allocation3]] }
  0x18   : > { %1220 = vset.pattern.permute.xlu2 %v1285_v2  ;;  %v343_v3 = vld [vmem:[%s1392_s26 + $0x78] sm:$0xff]  ;;  %v342_v6 = vld [vmem:[%s1392_s26 + $0x70] sm:$0xff]  ;;  %v341_v7 = vld [vmem:[%s1392_s26 + $0x68] sm:$0xff] }
  0x19   : > { %1095 = vmatpush.xpose.msk.msra.mxu0 %vm400_vm0, %v343_v3  ;;  %v340_v10 = vld [vmem:[%s1392_s26 + $0x60] sm:$0xff]  ;;  %v339_v11 = vld [vmem:[%s1392_s26 + $0x58] sm:$0xff]  ;;  %v338_v14 = vld [vmem:[%s1392_s26 + $0x50] sm:$0xff] }
  0x1a   : > { %v337_v15 = vld [vmem:[%s1392_s26 + $0x48] sm:$0xff]  ;;  %v532_v17 = vld [vmem:[%s1701_s5 + $0x10] sm:$0xff]  ;;  %v355_v18 = vld [vmem:[%s1699_s3 + $0x18] sm:$0xff] }
  0x1b   : > { %v336_v19 = vld [vmem:[%s1392_s26 + $0x40] sm:$0xff]  ;;  %377 = vperm.xlu2 %1220, %v355_v18   ;;  %v335_v20 = vld [vmem:[%s1392_s26 + $0x38] sm:$0xff]  ;;  %v354_v23 = vld [vmem:[%s1699_s3 + $0x10] sm:$0xff] }
  0x1c   : > { %v530_v21 = vld [vmem:[%s1701_s5] sm:$0xff]  ;;  %v1142_v22 = vld [vmem:[%s1701_s5 + $0x78] sm:$0xff]  ;;  %v334_v24 = vld [vmem:[%s1392_s26 + $0x30] sm:$0xff] }
  0x1d   : > { %1096 = vmatpush.xpose.msk.msra.mxu0 %vm400_vm0, %v342_v6  ;;  %v333_v25 = vld [vmem:[%s1392_s26 + $0x28] sm:$0xff]  ;;  %v1139_v27 = vld [vmem:[%s1701_s5 + $0x60] sm:$0xff]  ;;  %v537_v28 = vld [vmem:[%s1701_s5 + $0x38] sm:$0xff]  ;;  %p317_p11 = scmp.lt.s32.totalorder %s316_s23, 3 }
  0x1e   : > { %v1140_v26 = vld [vmem:[%s1701_s5 + $0x68] sm:$0xff]  ;;  %v332_v29 = vld [vmem:[%s1392_s26 + $0x20] sm:$0xff]  ;;  %v331_v30 = vld [vmem:[%s1392_s26 + $0x18] sm:$0xff] }
  0x1f   : > { %392 = vperm.xlu0 %1218, %v358_v4   ;;  %382 = vperm.xlu1 %1219, %v356_v5   ;;  %v1137_v31 = vld [vmem:[%s1701_s5 + $0x50] sm:$0xff]  ;;  %v1136_v32 = vld [vmem:[%s1701_s5 + $0x48] sm:$0xff]  ;;  %v534_v33 = vld [vmem:[%s1701_s5 + $0x20] sm:$0xff]  ;;  %s1714_s23 = smov (!%p317_p11, %s316_s23), 3 }
  0x20   : > { %v330_v34 = vld [vmem:[%s1392_s26 + $0x10] sm:$0xff]  ;;  %v329_v35 = vld [vmem:[%s1392_s26 + $0x8] sm:$0xff]  ;;  %v1159_v36 = vld [vmem:[%s1701_s5 + $0x80] sm:$0xff]  ;;  %s1177_s25 = sshll.u32 %s1714_s23, 6  ;;  %s326_s24 = scalar_lea.vmem %s1703_s7, %s1714_s23 }
  0x21   : > { %1097 = vmatpush.xpose.msk.msra.mxu0 %vm400_vm0, %v341_v7  ;;  %v1160_v37 = vld [vmem:[%s1701_s5 + $0x88] sm:$0xff]  ;;  %v328_v39 = vld [vmem:[%s1392_s26] sm:$0xff]  ;;  %v1162_v41 = vld [vmem:[%s1701_s5 + $0x98] sm:$0xff]  ;;  %s1511_s14 = scalar_lea.vmem %s1702_s6, %s1177_s25  ;;  %s308_s25 = sand.u32 1, %s1275_s30  }
  0x22   : > { %v531_v38 = vld [vmem:[%s1701_s5 + $0x8] sm:$0xff]  ;;  %v344_v40 = vld [vmem:[%s1698_s2] sm:$0xff]  ;;  %v1141_v43 = vld [vmem:[%s1701_s5 + $0x70] sm:$0xff]  ;;  %s309_s23 = scalar_lea.vmem [#allocation4], %s308_s25  ;;  %s993_s19 = scalar_lea.sflag [#allocation5], %s308_s25 }
  0x23   : > { %372 = vperm.xlu2 %1220, %v354_v23   ;;  %v1163_v42 = vld [vmem:[%s1701_s5 + $0xa0] sm:$0xff]  ;;  %v345_v44 = vld [vmem:[%s1698_s2 + $0x8] sm:$0xff]  ;;  %v1138_v47 = vld [vmem:[%s1701_s5 + $0x58] sm:$0xff]  ;;  %s1003_s13 = sshll.u32 %s309_s23, 4  ;;  %s1004_s13 = int_to_ptr.vmem [resolvable:$true] %s1003_s13 }
  0x24   : > { %v914_v45 = vld [vmem:[%s1511_s14] sm:$0xff]  ;;  %v915_v46 = vld [vmem:[%s1511_s14 + $0x8] sm:$0xff]  ;;  %v346_v48 = vld [vmem:[%s1698_s2 + $0x10] sm:$0xff] }
  0x25   : > { %1098 = vmatpush.xpose.msk.msra.mxu0 %vm400_vm0, %v340_v10  ;;  %v917_v49 = vld [vmem:[%s1511_s14 + $0x18] sm:$0xff]  ;;  %v1165_v50 = vld [vmem:[%s1701_s5 + $0xb0] sm:$0xff]  ;;  %v1135_v51 = vld [vmem:[%s1701_s5 + $0x40] sm:$0xff] }
  0x26   : > { %v347_v52 = vld [vmem:[%s1698_s2 + $0x18] sm:$0xff]  ;;  %v919_v54 = vld [vmem:[%s1511_s14 + $0x28] sm:$0xff]  ;;  %v1161_v55 = vld [vmem:[%s1701_s5 + $0x90] sm:$0xff] }
  0x27   : > { %367 = vperm.xlu0 %1218, %v353_v8   ;;  %362 = vperm.xlu1 %1219, %v352_v9   ;;  %v1166_v53 = vld [vmem:[%s1701_s5 + $0xb8] sm:$0xff]  ;;  %v348_v56 = vld [vmem:[%s1698_s2 + $0x20] sm:$0xff]  ;;  %v1164_v57 = vld [vmem:[%s1701_s5 + $0xa8] sm:$0xff] }
  0x28   : > { %v921_v58 = vld [vmem:[%s1511_s14 + $0x38] sm:$0xff]  ;;  %v983_v59 = vld [vmem:[%s326_s24] sm:$0x1]  ;;  %v349_v60 = vld [vmem:[%s1698_s2 + $0x28] sm:$0xff] }
  0x29   : > { %1099 = vmatpush.xpose.msk.msra.mxu0 %vm400_vm0, %v339_v11  ;;  %v916_v61 = vld [vmem:[%s1511_s14 + $0x10] sm:$0xff]  ;;  %v918_v63 = vld [vmem:[%s1511_s14 + $0x20] sm:$0xff]  ;;  %v351_v0 = vld [vmem:[%s1698_s2 + $0x38] sm:$0xff] }
  0x2a   : > { %v350_v62 = vld [vmem:[%s1698_s2 + $0x30] sm:$0xff] }
  0x2b   : > { %575 = vperm.xlu2 %1220, %v537_v28   ;;  %v920_v1 = vld [vmem:[%s1511_s14 + $0x30] sm:$0xff]  ;;  %s1235_s14 = sshra.s32 %s1006_s18, 4  ;;  %s1236_s14 = int_to_ptr.hbm [resolvable:$true] %s1235_s14 }
  0x2c   : > { %s1237_s20 = scalar_lea.hbm %s1236_s14, 1  ;;  %p1242_p1 = scmp.lt.s32.totalorder %s1236_s14, %s1704_s8 }
  0x2d   : > { %1100 = vmatpush.xpose.msk.msra.mxu0 %vm400_vm0, %v338_v14  ;;  %p1238_p12 = scmp.ne.s32.totalorder %s1236_s14, %s1237_s20  ;;  %p1243_p2 = scmp.lt.s32.totalorder %s1241_s21, %s1237_s20 }
  0x2f   : > { %570 = vperm.xlu0 %1218, %v536_v12   ;;  %565 = vperm.xlu1 %1219, %v535_v13   ;;  %p1239_p13 = pnand %p1238_p12, %p1372_p5  ;;  %p1244_p3 = por %p1243_p2, %p1242_p1 }
  0x31   : > { %1101 = vmatpush.xpose.msk.msra.mxu0 %vm400_vm0, %v337_v15  ;;  %p1240_p0 = pneg %p1239_p13 }
  0x33   : > { %560 = vperm.xlu2 %1220, %v534_v33   ;;  %p1245_p4 = pnand %p1244_p3, %p1240_p0 }
  0x35   : > { %1102 = vmatpush.xpose.msk.msra.mxu0 %vm400_vm0, %v336_v19 }
  0x37   : > { %555 = vperm.xlu0 %1218, %v533_v16   ;;  %550 = vperm.xlu1 %1219, %v532_v17  }
  0x39   : > { %1103 = vmatpush.xpose.msk.msra.mxu0 %vm400_vm0, %v335_v20 }
  0x3b   : > { %545 = vperm.xlu2 %1220, %v531_v38   ;;  %v526_v38 = vld [vmem:[%s1700_s4 + $0x20] sm:$0xff] }
  0x3d   : > { %1104 = vmatpush.xpose.msk.msra.mxu0 %vm400_vm0, %v334_v24 }
  0x3f   : > { %540 = vperm.xlu0 %1218, %v530_v21   ;;  %707 = vperm.xlu1 %1219, %v1142_v22  }
  0x41   : > { %1105 = vmatpush.xpose.msk.msra.mxu0 %vm400_vm0, %v333_v25 }
  0x43   : > { %702 = vperm.xlu2 %1220, %v1141_v43  }
  0x45   : > { %1106 = vmatpush.xpose.msk.msra.mxu0 %vm400_vm0, %v332_v29 }
  0x47   : > { %697 = vperm.xlu0 %1218, %v1140_v26   ;;  %692 = vperm.xlu1 %1219, %v1139_v27  }
  0x49   : > { %1107 = vmatpush.xpose.msk.msra.mxu0 %vm400_vm0, %v331_v30 }
  0x4b   : > { %687 = vperm.xlu2 %1220, %v1138_v47  }
  0x4d   : > { %1108 = vmatpush.xpose.msk.msra.mxu0 %vm400_vm0, %v330_v34  ;;  %v522_v34 = vld [vmem:[%s1700_s4] sm:$0xff] }
  0x4f   : > { %682 = vperm.xlu0 %1218, %v1137_v31   ;;  %677 = vperm.xlu1 %1219, %v1136_v32  }
  0x51   : > { %1109 = vmatpush.xpose.msk.msra.mxu0 %vm400_vm0, %v329_v35  ;;  %v523_v35 = vld [vmem:[%s1700_s4 + $0x8] sm:$0xff] }
  0x53   : > { %672 = vperm.xlu2 %1220, %v1135_v51  }
  0x55   : > { %1110 = vmatpush.xpose.msk.msra.mxu0 %vm400_vm0, %v328_v39  ;;  %v527_v39 = vld [vmem:[%s1700_s4 + $0x28] sm:$0xff] }
  0x57   : > { %803 = vperm.xlu0 %1218, %v1159_v36   ;;  %808 = vperm.xlu1 %1219, %v1160_v37   ;;  %v524_v36 = vld [vmem:[%s1700_s4 + $0x10] sm:$0xff]  ;;  %v525_v37 = vld [vmem:[%s1700_s4 + $0x18] sm:$0xff] }
  0x58   : > { %1111 = vmatmul.msk.f32.vlgmr.msra.gmra.mxu0 %vm400_vm0, %v344_v40  ;;  %v528_v40 = vld [vmem:[%s1700_s4 + $0x30] sm:$0xff] }
  0x5b   : > { %813 = vperm.xlu2 %1220, %v1161_v55  }
  0x5f   : > { %818 = vperm.xlu0 %1218, %v1162_v41   ;;  %823 = vperm.xlu1 %1219, %v1163_v42   ;;  %v529_v41 = vld [vmem:[%s1700_s4 + $0x38] sm:$0xff] }
  0x60   : > { %1112 = vmatmul.msk.f32.gmra.mxu0 %vm400_vm0, %v345_v44 }
  0x63   : > { %828 = vperm.xlu2 %1220, %v1164_v57  }
  0x67   : > { %924 = vperm.xlu0 %1218, %v914_v45   ;;  %929 = vperm.xlu1 %1219, %v915_v46  }
  0x68   : > { %1113 = vmatmul.msk.f32.gmra.mxu0 %vm400_vm0, %v346_v48 }
  0x6b   : > { %934 = vperm.xlu2 %1220, %v916_v61  }
  0x6f   : > { %939 = vperm.xlu0 %1218, %v917_v49   ;;  %833 = vperm.xlu1 %1219, %v1165_v50  }
  0x70   : > { %1114 = vmatmul.msk.f32.gmra.mxu0 %vm400_vm0, %v347_v52 }
  0x73   : > { %944 = vperm.xlu2 %1220, %v918_v63  }
  0x75   : > { %v378_v11 = vpop.permute.xlu2 %377 }
  0x77   : > { %838 = vperm.xlu0 %1218, %v1166_v53   ;;  %949 = vperm.xlu1 %1219, %v919_v54  }
  0x78   : > { %1115 = vmatmul.msk.f32.gmra.mxu0 %vm400_vm0, %v348_v56 }
  0x7b   : > { %954 = vperm.xlu2 %1220, %v920_v1  }
  0x7d   : > { %v373_v23 = vpop.permute.xlu2 %372 }
  0x7f   : > { %959 = vperm.xlu0 %1218, %v921_v58   ;;  %986 = vperm.xlu1 %1219, %v983_v59  }
  0x80   : > { %1116 = vmatmul.msk.f32.gmra.mxu0 %vm400_vm0, %v349_v60 }
  0x85   : > { %v576_v48 = vpop.permute.xlu2 %575 }
  0x88   : > { %1117 = vmatmul.msk.f32.gmra.mxu0 %vm400_vm0, %v350_v62 }
  0x89   : > { %v398_v8 = vpop.permute.xlu0 %397  ;;  %v388_v9 = vpop.permute.xlu1 %387 }
  0x8d   : > { %v561_v52 = vpop.permute.xlu2 %560 }
  0x90   : > { %1118 = vmatmul.msk.f32.gmra.mxu0 %vm400_vm0, %v351_v0 }
  0x91   : > { %v393_v12 = vpop.permute.xlu0 %392  ;;  %v383_v16 = vpop.permute.xlu1 %382 }
  0x99   : > { %v368_v26 = vpop.permute.xlu0 %367  ;;  %v363_v29 = vpop.permute.xlu1 %362 }
  0xa1   : > { %v571_v49 = vpop.permute.xlu0 %570  ;;  %v566_v51 = vpop.permute.xlu1 %565 }
  0xa9   : > { %v556_v56 = vpop.permute.xlu0 %555  ;;  %v551_v63 = vpop.permute.xlu1 %550 }
  0xd5   : > { %v490_v2 = vpop.f32.mrf.mxu0 }
  0xd6   : > { %v491_v30 = vadd.f32 %v490_v2, %v363_v29  ;;  %v546_v2 = vpop.permute.xlu2 %545 }
  0xd8   : > { %v514_v33 = vmax.f32 %v491_v30, 0.0 }
  0xdd   : > { %v493_v3 = vpop.f32.mrf.mxu0 }
  0xde   : > { %v494_v27 = vadd.f32 %v493_v3, %v368_v26 }
  0xe0   : > { %v515_v32 = vmax.f32 %v494_v27, 0.0 }
  0xe5   : > { %v496_v4 = vpop.f32.mrf.mxu0 }
  0xe6   : > { %v497_v24 = vadd.f32 %v496_v4, %v373_v23 }
  0xe8   : > { %v516_v31 = vmax.f32 %v497_v24, 0.0  ;;  %v708_v24 = vpop.permute.xlu1 %707 }
  0xed   : > { %v499_v5 = vpop.f32.mrf.mxu0 }
  0xee   : > { %v500_v21 = vadd.f32 %v499_v5, %v378_v11  ;;  %v541_v5 = vpop.permute.xlu0 %540  ;;  %v1128_v11 = vld [vmem:[%s1700_s4 + $0x48] sm:$0xff] }
  0xf0   : > { %v517_v28 = vmax.f32 %v500_v21, 0.0 }
  0xf5   : > { %v502_v6 = vpop.f32.mrf.mxu0 }
  0xf6   : > { %v503_v19 = vadd.f32 %v502_v6, %v383_v16  ;;  %v1133_v16 = vld [vmem:[%s1700_s4 + $0x70] sm:$0xff]  ;;  %v698_v27 = vpop.permute.xlu0 %697 }
  0xf8   : > { %v518_v25 = vmax.f32 %v503_v19, 0.0 }
  0xfd   : > { %v505_v7 = vpop.f32.mrf.mxu0 }
  0xfe   : > { %v506_v17 = vadd.f32 %v505_v7, %v388_v9 }
 0x100   : > { %v519_v22 = vmax.f32 %v506_v17, 0.0  ;;  %v1134_v17 = vld [vmem:[%s1700_s4 + $0x78] sm:$0xff] }
 0x105   : > { %v508_v10 = vpop.f32.mrf.mxu0 }
 0x106   : > { %v509_v14 = vadd.f32 %v508_v10, %v393_v12  ;;  %v1127_v10 = vld [vmem:[%s1700_s4 + $0x40] sm:$0xff]  ;;  %v1129_v12 = vld [vmem:[%s1700_s4 + $0x50] sm:$0xff] }
 0x108   : > { %v520_v20 = vmax.f32 %v509_v14, 0.0  ;;  %v1131_v14 = vld [vmem:[%s1700_s4 + $0x60] sm:$0xff] }
 0x10d   : > { %v511_v13 = vpop.f32.mrf.mxu0 }
 0x10e   : > { %v512_v15 = vadd.f32 %v511_v13, %v398_v8  ;;  %v1130_v13 = vld [vmem:[%s1700_s4 + $0x58] sm:$0xff] }
 0x110   : > { %v521_v18 = vmax.f32 %v512_v15, 0.0  ;;  %v1132_v15 = vld [vmem:[%s1700_s4 + $0x68] sm:$0xff] }
 0x112   : > { %611 = vmatpush.msra.mxu1 %v521_v18 }
 0x114   : > { %612 = vmatpush.msra.mxu1 %v520_v20 }
 0x116   : > { %613 = vmatpush.msra.mxu1 %v519_v22 }
 0x118   : > { %614 = vmatpush.msra.mxu1 %v518_v25  ;;  %v703_v25 = vpop.permute.xlu2 %702 }
 0x11a   : > { %615 = vmatpush.msra.mxu1 %v517_v28  ;;  %v693_v28 = vpop.permute.xlu1 %692 }
 0x11c   : > { %616 = vmatpush.msra.mxu1 %v516_v31 }
 0x11e   : > { %617 = vmatpush.msra.mxu1 %v515_v32 }
 0x120   : > { %618 = vmatpush.msra.mxu1 %v514_v33  ;;  %v688_v32 = vpop.permute.xlu2 %687 }
 0x121   : > { %1119 = vmatmul.msk.f32.vlgmr.msra.gmra.mxu1 %vm578_vm1, %v522_v34 }
 0x129   : > { %1120 = vmatmul.msk.f32.gmra.mxu1 %vm578_vm1, %v523_v35 }
 0x131   : > { %1121 = vmatmul.msk.f32.gmra.mxu1 %vm578_vm1, %v524_v36 }
 0x139   : > { %1122 = vmatmul.msk.f32.gmra.mxu1 %vm578_vm1, %v525_v37 }
 0x141   : > { %1123 = vmatmul.msk.f32.gmra.mxu1 %vm578_vm1, %v526_v38 }
 0x149   : > { %1124 = vmatmul.msk.f32.gmra.mxu1 %vm578_vm1, %v527_v39  ;;  %v683_v39 = vpop.permute.xlu0 %682 }
 0x151   : > { %1125 = vmatmul.msk.f32.gmra.mxu1 %vm578_vm1, %v528_v40 }
 0x159   : > { %1126 = vmatmul.msk.f32.gmra.mxu1 %vm578_vm1, %v529_v41 }
 0x19e   : > { %v620_v42 = vpop.f32.mrf.mxu1 }
 0x19f   : > { %v621_v6 = vadd.f32 %v620_v42, %v541_v5  ;;  %v678_v42 = vpop.permute.xlu1 %677 }
 0x1a1   : > { %v644_v9 = vmax.f32 %v621_v6, 0.0 }
 0x1a6   : > { %v623_v43 = vpop.f32.mrf.mxu1 }
 0x1a7   : > { %v624_v3 = vadd.f32 %v623_v43, %v546_v2 }
 0x1a9   : > { %v645_v8 = vmax.f32 %v624_v3, 0.0 }
 0x1ae   : > { %v626_v44 = vpop.f32.mrf.mxu1 }
 0x1af   : > { %v627_v0 = vadd.f32 %v626_v44, %v551_v63 }
 0x1b1   : > { %v646_v7 = vmax.f32 %v627_v0, 0.0 }
 0x1b6   : > { %v629_v45 = vpop.f32.mrf.mxu1 }
 0x1b7   : > { %v630_v61 = vadd.f32 %v629_v45, %v556_v56  ;;  %v673_v45 = vpop.permute.xlu2 %672  ;;  %v1157_v56 = vld [vmem:[%s1700_s4 + $0xb0] sm:$0xff] }
 0x1b9   : > { %v647_v4 = vmax.f32 %v630_v61, 0.0  ;;  %v809_v61 = vpop.permute.xlu1 %808 }
 0x1be   : > { %v632_v46 = vpop.f32.mrf.mxu1 }
 0x1bf   : > { %v633_v59 = vadd.f32 %v632_v46, %v561_v52  ;;  %v1153_v52 = vld [vmem:[%s1700_s4 + $0x90] sm:$0xff] }
 0x1c1   : > { %v648_v1 = vmax.f32 %v633_v59, 0.0 }
 0x1c6   : > { %v635_v47 = vpop.f32.mrf.mxu1 }
 0x1c7   : > { %v636_v57 = vadd.f32 %v635_v47, %v566_v51  ;;  %v1152_v51 = vld [vmem:[%s1700_s4 + $0x88] sm:$0xff] }
 0x1c9   : > { %v649_v62 = vmax.f32 %v636_v57, 0.0  ;;  %v1158_v57 = vld [vmem:[%s1700_s4 + $0xb8] sm:$0xff] }
 0x1ce   : > { %v638_v50 = vpop.f32.mrf.mxu1 }
 0x1cf   : > { %v639_v54 = vadd.f32 %v638_v50, %v571_v49  ;;  %v1151_v50 = vld [vmem:[%s1700_s4 + $0x80] sm:$0xff] }
 0x1d1   : > { %v650_v60 = vmax.f32 %v639_v54, 0.0  ;;  %v1155_v54 = vld [vmem:[%s1700_s4 + $0xa0] sm:$0xff] }
 0x1d6   : > { %v641_v53 = vpop.f32.mrf.mxu1 }
 0x1d7   : > { %v642_v55 = vadd.f32 %v641_v53, %v576_v48  ;;  %v1154_v53 = vld [vmem:[%s1700_s4 + $0x98] sm:$0xff] }
 0x1d9   : > { %v651_v58 = vmax.f32 %v642_v55, 0.0  ;;  %v1156_v55 = vld [vmem:[%s1700_s4 + $0xa8] sm:$0xff] }
 0x1db   : > { %742 = vmatpush.msra.mxu2 %v651_v58 }
 0x1dd   : > { %743 = vmatpush.msra.mxu2 %v650_v60  ;;  %v804_v60 = vpop.permute.xlu0 %803 }
 0x1df   : > { %744 = vmatpush.msra.mxu2 %v649_v62  ;;  %v814_v62 = vpop.permute.xlu2 %813 }
 0x1e1   : > { %745 = vmatpush.msra.mxu2 %v648_v1  ;;  %v824_v1 = vpop.permute.xlu1 %823 }
 0x1e3   : > { %746 = vmatpush.msra.mxu2 %v647_v4 }
 0x1e5   : > { %747 = vmatpush.msra.mxu2 %v646_v7  ;;  %v819_v0 = vpop.permute.xlu0 %818 }
 0x1e7   : > { %748 = vmatpush.msra.mxu2 %v645_v8  ;;  %v829_v3 = vpop.permute.xlu2 %828 }
 0x1e9   : > { %749 = vmatpush.msra.mxu2 %v644_v9  ;;  %v930_v6 = vpop.permute.xlu1 %929 }
 0x1ea   : > { %1143 = vmatmul.msk.f32.vlgmr.msra.gmra.mxu2 %vm578_vm1, %v1127_v10 }
 0x1ed   : > { %v925_v4 = vpop.permute.xlu0 %924 }
 0x1ef   : > { %v935_v7 = vpop.permute.xlu2 %934 }
 0x1f2   : > { %1144 = vmatmul.msk.f32.gmra.mxu2 %vm578_vm1, %v1128_v11 }
 0x1f5   : > { %v940_v9 = vpop.permute.xlu0 %939 }
 0x1fa   : > { %1145 = vmatmul.msk.f32.gmra.mxu2 %vm578_vm1, %v1129_v12 }
 0x202   : > { %1146 = vmatmul.msk.f32.gmra.mxu2 %vm578_vm1, %v1130_v13 }
 0x20a   : > { %1147 = vmatmul.msk.f32.gmra.mxu2 %vm578_vm1, %v1131_v14 }
 0x212   : > { %1148 = vmatmul.msk.f32.gmra.mxu2 %vm578_vm1, %v1132_v15  ;;  %v834_v15 = vpop.permute.xlu1 %833 }
 0x21a   : > { %1149 = vmatmul.msk.f32.gmra.mxu2 %vm578_vm1, %v1133_v16 }
 0x222   : > { %1150 = vmatmul.msk.f32.gmra.mxu2 %vm578_vm1, %v1134_v17 }
 0x26d   : > { %v751_v18 = vpop.f32.mrf.mxu2 }
 0x26e   : > { %v752_v46 = vadd.f32 %v751_v18, %v673_v45 }
 0x270   : > { %v775_v49 = vmax.f32 %v752_v46, 0.0 }
 0x275   : > { %v754_v19 = vpop.f32.mrf.mxu2 }
 0x276   : > { %v755_v43 = vadd.f32 %v754_v19, %v678_v42  ;;  %v945_v19 = vpop.permute.xlu2 %944 }
 0x278   : > { %v776_v48 = vmax.f32 %v755_v43, 0.0 }
 0x27d   : > { %v757_v20 = vpop.f32.mrf.mxu2 }
 0x27e   : > { %v758_v40 = vadd.f32 %v757_v20, %v683_v39 }
 0x280   : > { %v777_v47 = vmax.f32 %v758_v40, 0.0 }
 0x285   : > { %v760_v21 = vpop.f32.mrf.mxu2 }
 0x286   : > { %v761_v37 = vadd.f32 %v760_v21, %v688_v32 }
 0x288   : > { %v778_v44 = vmax.f32 %v761_v37, 0.0 }
 0x28d   : > { %v763_v22 = vpop.f32.mrf.mxu2 }
 0x28e   : > { %v764_v35 = vadd.f32 %v763_v22, %v693_v28  ;;  %v839_v28 = vpop.permute.xlu0 %838 }
 0x290   : > { %v779_v41 = vmax.f32 %v764_v35, 0.0  ;;  %v950_v35 = vpop.permute.xlu1 %949 }
 0x295   : > { %v766_v23 = vpop.f32.mrf.mxu2 }
 0x296   : > { %v767_v33 = vadd.f32 %v766_v23, %v698_v27  ;;  %v960_v45 = vpop.permute.xlu0 %959 }
 0x298   : > { %v780_v38 = vmax.f32 %v767_v33, 0.0 }
 0x29d   : > { %v769_v26 = vpop.f32.mrf.mxu2 }
 0x29e   : > { %v770_v30 = vadd.f32 %v769_v26, %v703_v25 }
 0x2a0   : > { %v781_v36 = vmax.f32 %v770_v30, 0.0 }
 0x2a5   : > { %v772_v29 = vpop.f32.mrf.mxu2 }
 0x2a6   : > { %v773_v31 = vadd.f32 %v772_v29, %v708_v24 }
 0x2a8   : > { %v782_v34 = vmax.f32 %v773_v31, 0.0 }
 0x2aa   : > { %873 = vmatpush.msra.mxu3 %v782_v34 }
 0x2ac   : > { %874 = vmatpush.msra.mxu3 %v781_v36 }
 0x2ae   : > { %875 = vmatpush.msra.mxu3 %v780_v38  ;;  %v955_v38 = vpop.permute.xlu2 %954 }
 0x2b0   : > { %876 = vmatpush.msra.mxu3 %v779_v41 }
 0x2b2   : > { %877 = vmatpush.msra.mxu3 %v778_v44 }
 0x2b4   : > { %878 = vmatpush.msra.mxu3 %v777_v47 }
 0x2b6   : > { %879 = vmatpush.msra.mxu3 %v776_v48 }
 0x2b8   : > { %880 = vmatpush.msra.mxu3 %v775_v49 }
 0x2b9   : > { %1167 = vmatmul.msk.f32.vlgmr.msra.gmra.mxu3 %vm578_vm1, %v1151_v50 }
 0x2c1   : > { %1168 = vmatmul.msk.f32.gmra.mxu3 %vm578_vm1, %v1152_v51 }
 0x2c9   : > { %1169 = vmatmul.msk.f32.gmra.mxu3 %vm578_vm1, %v1153_v52 }
 0x2d1   : > { %1170 = vmatmul.msk.f32.gmra.mxu3 %vm578_vm1, %v1154_v53  ;;  %v987_v53 = vpop.permute.xlu1 %986 }
 0x2d9   : > { %1171 = vmatmul.msk.f32.gmra.mxu3 %vm578_vm1, %v1155_v54 }
 0x2e1   : > { %1172 = vmatmul.msk.f32.gmra.mxu3 %vm578_vm1, %v1156_v55  ;;  %v989_v55 = vperm.slane %v987_v53, 0 }
 0x2e9   : > { %1173 = vmatmul.msk.f32.gmra.mxu3 %vm578_vm1, %v1157_v56 }
 0x2f1   : > { %1174 = vmatmul.msk.f32.gmra.mxu3 %vm578_vm1, %v1158_v57 }
 0x33c   : > { %v882_v58 = vpop.f32.mrf.mxu3 }
 0x33d   : > { %v883_v11 = vadd.f32 %v882_v58, %v804_v60 }
 0x33f   : > { %v906_v16 = vmax.f32 %v883_v11, 0.0 }
 0x341   : > { %v962_v24 = vmul.f32 %v925_v4, %v906_v16 }
 0x344   : > { %v885_v59 = vpop.f32.mrf.mxu3 }
 0x345   : > { %v886_v8 = vadd.f32 %v885_v59, %v809_v61 }
 0x347   : > { %v907_v13 = vmax.f32 %v886_v8, 0.0 }
 0x349   : > { %v963_v20 = vmul.f32 %v930_v6, %v907_v13 }
 0x34b   : > { %v970_v29 = vadd.f32 %v963_v20, %v962_v24 }
 0x34c   : > { %v888_v63 = vpop.f32.mrf.mxu3 }
 0x34d   : > { %v889_v12 = vadd.f32 %v888_v63, %v814_v62 }
 0x34f   : > { %v908_v17 = vmax.f32 %v889_v12, 0.0 }
 0x351   : > { %v964_v25 = vmul.f32 %v935_v7, %v908_v17 }
 0x353   : > { %v971_v32 = vadd.f32 %v970_v29, %v964_v25 }
 0x354   : > { %v891_v2 = vpop.f32.mrf.mxu3 }
 0x355   : > { %v892_v14 = vadd.f32 %v891_v2, %v819_v0 }
 0x357   : > { %v909_v21 = vmax.f32 %v892_v14, 0.0 }
 0x359   : > { %v965_v30 = vmul.f32 %v940_v9, %v909_v21 }
 0x35b   : > { %v972_v36 = vadd.f32 %v971_v32, %v965_v30 }
 0x35c   : > { %v894_v5 = vpop.f32.mrf.mxu3 }
 0x35d   : > { %v895_v18 = vadd.f32 %v894_v5, %v824_v1 }
 0x35f   : > { %v910_v26 = vmax.f32 %v895_v18, 0.0 }
 0x361   : > { %v966_v33 = vmul.f32 %v945_v19, %v910_v26 }
 0x363   : > { %v973_v40 = vadd.f32 %v972_v36, %v966_v33 }
 0x364   : > { %v897_v10 = vpop.f32.mrf.mxu3 }
 0x365   : > { %v898_v22 = vadd.f32 %v897_v10, %v829_v3 }
 0x367   : > { %v911_v31 = vmax.f32 %v898_v22, 0.0 }
 0x369   : > { %v967_v37 = vmul.f32 %v950_v35, %v911_v31 }
 0x36b   : > { %v974_v43 = vadd.f32 %v973_v40, %v967_v37 }
 0x36c   : > { %v900_v23 = vpop.f32.mrf.mxu3 }
 0x36d   : > { %v901_v27 = vadd.f32 %v900_v23, %v834_v15 }
 0x36f   : > { %v912_v34 = vmax.f32 %v901_v27, 0.0 }
 0x371   : > { %v968_v41 = vmul.f32 %v955_v38, %v912_v34 }
 0x373   : > { %v975_v46 = vadd.f32 %v974_v43, %v968_v41 }
 0x374   : > { %v903_v39 = vpop.f32.mrf.mxu3 }
 0x375   : > { %v904_v42 = vadd.f32 %v903_v39, %v839_v28 }
 0x377   : > { %v913_v44 = vmax.f32 %v904_v42, 0.0 }
 0x379   : > { %v969_v47 = vmul.f32 %v960_v45, %v913_v44 }
 0x37b   : > { %v976_v48 = vadd.f32 %v975_v46, %v969_v47 }
 0x37d   : > { %v977_v49 = vrot.slane %v976_v48, 4 }
 0x37f   : > { %v978_v50 = vadd.f32 %v977_v49, %v976_v48 }
 0x381   : > { %v979_v51 = vrot.slane %v978_v50, 2 }
 0x383   : > { %v980_v52 = vadd.f32 %v979_v51, %v978_v50 }
 0x385   : > { %v981_v54 = vrot.slane %v980_v52, 1 }
 0x387   : > { %v982_v56 = vadd.f32 %v981_v54, %v980_v52 }
 0x389   : > { %v990_v57 = vadd.f32 %v989_v55, %v982_v56 }
 0x38b   : > { %991 = vst [vmem:[%s309_s23] sm:$0x1] %v990_v57 }
 0x38c   : > { %1248 = shalt.err (!%p1245_p4)
}
 0x38d   : > { %1178 = dma.vmem_to_hbm [thread:$0]  (%p1372_p5), %s1004_s13, 16, %s1006_s18, %s993_s19  }
 0x38e PF: > { %p1184_p7 = scmp.ge.s32.totalorder %s1283_s10, 2  ;;  %s1017_s25 = sand.u32 1, %s1271_s29  }
 0x38f   : > { %s1018_s27 = scalar_lea.sflag [#allocation5], %s1017_s25 }
 0x390   : > { %p1181_p8 = pnand %p1184_p7, %p1376_p6 }
 0x392   : > { %p1182_p9 = pneg %p1181_p8 }
 0x394   : > { %1266 = dma.done.wait (%p1182_p9), %s1018_s27, 16  }
 0x395   : > { %1268 = vsyncadd (%p1182_p9), %s1018_s27, 4294967280  ;;  %p19_p10 = scmp.ge.s32.totalorder %s1359_s12, 6   ;;  %s1707_s29 = smov %s1275_s30 }
 0x396   : > { %s1708_s30 = smov %s1279_s9  ;;  %s1709_s9 = smov %s1370_s15 }
 0x397   : > { %s1710_s10 = smov %s1359_s12  ;;  %21 = sbr.rel (!%p19_p10) target bundleno = 5 (0x5), region = 93 }
 0x39c   :  { %1023 = vsyncpa [#allocation5], 1 }
 0x39d   :  { %1025 = vsyncpa [#allocation5 + $0x1], 1 }

</bundles_post_ra>
